<compile_context>
chip_gen: v6e
topology: v6e:2x2x1
jax: 0.10.0
libtpu: 0.0.40
codegen_flags: <defaults>
</compile_context>

<pallas_src>
import jax
import jax.numpy as jnp
from jax import lax
from jax.experimental import pallas as pl
from jax.experimental.pallas import tpu as pltpu

_EPS = 1e-5        # PyTorch nn.LayerNorm default eps
_LANE = 128        # TPU lane width
_SUBLANE = 8       # f32 sublane count
_TN_MAX = 2048     # max output-column tile (bounds the W3 panel in VMEM)
_TM_MAX = 128      # max row tile (saturates v5e MXU; fine on v6e/v7x)


def _round_up(a, b):
    return (a + b - 1) // b * b


def _layernorm(h, gamma, beta):
    # Fused single-pass moments: sum and sum-of-squares issue back-to-back on
    # the XLU instead of three dependent mean/center/mean chains.
    inv_n = 1.0 / h.shape[-1]
    s = jnp.sum(h, axis=-1, keepdims=True)
    s2 = jnp.sum(h * h, axis=-1, keepdims=True)
    mu = s * inv_n
    var = s2 * inv_n - mu * mu            # biased variance, as torch
    return (h - mu) * lax.rsqrt(var + _EPS) * gamma + beta


def skolemizer_kernel(x_ref, w1_ref, vecs_ref, w2_ref, w3_ref, b3_ref, out_ref):
    x = x_ref[...]                                    # (TM, D)   f32
    vecs = vecs_ref[...]                              # (8, H)    f32 packed
    b1, g1, be1 = vecs[0:1], vecs[1:2], vecs[2:3]
    b2, g2, be2 = vecs[3:4], vecs[4:5], vecs[5:6]

    # MLPBlock(input_dim, H): Linear -> ReLU -> LayerNorm (Dropout = identity)
    z1 = jnp.dot(x.astype(jnp.bfloat16), w1_ref[...],
                 preferred_element_type=jnp.float32) + b1
    h1 = _layernorm(jnp.maximum(z1, 0.0), g1, be1)    # (TM, H) f32

    # Residual(MLPBlock(H, H))
    z2 = jnp.dot(h1.astype(jnp.bfloat16), w2_ref[...],
                 preferred_element_type=jnp.float32) + b2
    h2 = _layernorm(jnp.maximum(z2, 0.0), g2, be2)
    h = h1 + h2                                       # (TM, H) f32

    # Final Linear(H, out) column panel + sigmoid (exp + approx recip on EUP).
    logits = jnp.dot(h.astype(jnp.bfloat16), w3_ref[...],
                     preferred_element_type=jnp.float32) + b3_ref[...]
    p = pl.reciprocal(1.0 + jnp.exp(-logits), approx=True)
    out_ref[...] = jnp.minimum(p, 1.0)                # clamp approx overshoot


def skolemizer_forward(x, packed_params, nb_rels, nb_individuals):
    """x: (D,), (1, D) or (B, D) float32.

    Returns (nb_rels, nb_individuals) for a single sample (module semantics)
    or (B, nb_rels, nb_individuals) for a batch.
    """
    w1, vecs, w2, w3, b3 = packed_params
    single = (x.ndim == 1)
    if single:
        x = x[None, :]
    B, D = x.shape
    H = w1.shape[1]
    out_dim = nb_rels * nb_individuals
    out_pad = w3.shape[1]

    # Row tiling: pad batch to >= 8 rows (f32 sublane), tile at <= 128 rows.
    TM = min(_round_up(max(B, _SUBLANE), _SUBLANE), _TM_MAX)
    M_pad = _round_up(max(B, _SUBLANE), TM)
    # Column tiling: lane-dense tiles; W3 panel bounded for v7x VMEM budget.
    TN = min(out_pad, _TN_MAX)
    assert out_pad % TN == 0 and TN % _LANE == 0

    x_p = jnp.pad(x.astype(jnp.float32), ((0, M_pad - B), (0, 0)))

    grid = (M_pad // TM, out_pad // TN)
    out = pl.pallas_call(
        skolemizer_kernel,
        out_shape=jax.ShapeDtypeStruct((M_pad, out_pad), jnp.float32),
        grid=grid,
        in_specs=[
            pl.BlockSpec((TM, D), lambda i, j: (i, 0)),    # x row tile
            pl.BlockSpec((D, H), lambda i, j: (0, 0)),     # W1 (resident)
            pl.BlockSpec((8, H), lambda i, j: (0, 0)),     # packed LN/bias vecs
            pl.BlockSpec((H, H), lambda i, j: (0, 0)),     # W2 (resident)
            pl.BlockSpec((H, TN), lambda i, j: (0, j)),    # W3 column panel
            pl.BlockSpec((1, TN), lambda i, j: (0, j)),    # b3 column panel
        ],
        out_specs=pl.BlockSpec((TM, TN), lambda i, j: (i, j)),
        compiler_params=pltpu.CompilerParams(
            dimension_semantics=("parallel", "parallel"),
            vmem_limit_bytes=32 * 1024 * 1024,
        ),
    )(x_p, w1, vecs, w2, w3, b3)

    out = out[:B, :out_dim]
    if single or B == 1:
        return out.reshape(nb_rels, nb_individuals)
    return out.reshape(B, nb_rels, nb_individuals)


def init_skolemizer_params(key, input_dim, hidden, nb_rels, nb_individuals):
    """Natural f32 params, weights stored (in_features, out_features);
    LayerNorm gamma=1, beta=0 (torch default)."""
    out_dim = nb_rels * nb_individuals
    k1, k2, k3, k4, k5, k6 = jax.random.split(key, 6)
    f32 = jnp.float32
    w1 = jax.random.normal(k1, (input_dim, hidden), f32) * (1.0 / jnp.sqrt(input_dim))
    b1 = jax.random.normal(k2, (hidden,), f32) * 0.01
    g1 = jnp.ones((hidden,), f32)
    be1 = jnp.zeros((hidden,), f32)
    w2 = jax.random.normal(k3, (hidden, hidden), f32) * (1.0 / jnp.sqrt(hidden))
    b2 = jax.random.normal(k4, (hidden,), f32) * 0.01
    g2 = jnp.ones((hidden,), f32)
    be2 = jnp.zeros((hidden,), f32)
    w3 = jax.random.normal(k5, (hidden, out_dim), f32) * (1.0 / jnp.sqrt(hidden))
    b3 = jax.random.normal(k6, (out_dim,), f32) * 0.01
    return dict(w1=w1, b1=b1, g1=g1, be1=be1,
                w2=w2, b2=b2, g2=g2, be2=be2, w3=w3, b3=b3)


def pack_skolemizer_params(p):
    """Kernel layout: bf16 weights; the six (H,) vectors packed into one (8, H)
    f32 operand; W3/b3 zero-padded lane-dense (out_dim -> multiple of 128, or of
    _TN_MAX when a column grid is needed)."""
    hidden = p["w1"].shape[1]
    out_dim = p["w3"].shape[1]
    out_pad = _round_up(out_dim, _LANE)
    if out_pad > _TN_MAX:
        out_pad = _round_up(out_dim, _TN_MAX)
    vecs = jnp.zeros((8, hidden), jnp.float32)
    vecs = vecs.at[0].set(p["b1"]).at[1].set(p["g1"]).at[2].set(p["be1"])
    vecs = vecs.at[3].set(p["b2"]).at[4].set(p["g2"]).at[5].set(p["be2"])
    w3 = jnp.pad(p["w3"], ((0, 0), (0, out_pad - out_dim)))
    b3 = jnp.pad(p["b3"], (0, out_pad - out_dim))[None, :]
    return (p["w1"].astype(jnp.bfloat16), vecs,
            p["w2"].astype(jnp.bfloat16),
            w3.astype(jnp.bfloat16), b3.astype(jnp.float32))


def skolemizer_reference(x, p, nb_rels, nb_individuals):
    """Pure-JAX f32 reference (PyTorch eval semantics)."""
    def ln(h, g, b):
        mu = jnp.mean(h, axis=-1, keepdims=True)
        var = jnp.mean((h - mu) ** 2, axis=-1, keepdims=True)
        return (h - mu) / jnp.sqrt(var + _EPS) * g + b
    h1 = ln(jnp.maximum(x @ p["w1"] + p["b1"], 0.0), p["g1"], p["be1"])
    h2 = ln(jnp.maximum(h1 @ p["w2"] + p["b2"], 0.0), p["g2"], p["be2"])
    h = h1 + h2
    out = jax.nn.sigmoid(h @ p["w3"] + p["b3"])
    if x.ndim == 1:
        return out.reshape(nb_rels, nb_individuals)
    return out.reshape(x.shape[0], nb_rels, nb_individuals)


if __name__ == "__main__":
    # Small shapes consistent with the module: one hidden block of width 128,
    # output viewed as (nb_rels, nb_individuals).
    input_dim = 32
    hidden = 128
    nb_rels = 4
    nb_individuals = 128

    key = jax.random.PRNGKey(0)
    kx, kb, kp = jax.random.split(key, 3)
    params = init_skolemizer_params(kp, input_dim, hidden, nb_rels, nb_individuals)
    packed = pack_skolemizer_params(params)

    # Module-faithful single-sample call: x_features -> (nb_rels, nb_individuals).
    x = jax.random.normal(kx, (input_dim,), jnp.float32)
    out = jax.block_until_ready(
        skolemizer_forward(x, packed, nb_rels, nb_individuals))
    assert out.shape == (nb_rels, nb_individuals), out.shape
    assert out.dtype == jnp.float32
    assert bool(jnp.all((out >= 0.0) & (out <= 1.0)))          # sigmoid range
    ref = skolemizer_reference(x, params, nb_rels, nb_individuals)
    err = float(jnp.max(jnp.abs(out - ref)))
    assert err < 5e-2, err                                     # bf16-weight tol

    # Batched path (rows padded to a multiple of 8, tiled over the grid).
    xb = jax.random.normal(kb, (5, input_dim), jnp.float32)
    outb = jax.block_until_ready(
        skolemizer_forward(xb, packed, nb_rels, nb_individuals))
    assert outb.shape == (5, nb_rels, nb_individuals), outb.shape
    refb = skolemizer_reference(xb, params, nb_rels, nb_individuals)
    errb = float(jnp.max(jnp.abs(outb - refb)))
    assert errb < 5e-2, errb

    print("KERNEL_OK")
</pallas_src>

<mosaic_0001>
module attributes {stable_mosaic.version = 11 : i64} {
  func.func @skolemizer_kernel(%arg0: i32, %arg1: i32, %arg2: memref<8x32xf32, #tpu.memory_space<vmem>>, %arg3: memref<32x128xbf16, #tpu.memory_space<vmem>>, %arg4: memref<8x128xf32, #tpu.memory_space<vmem>>, %arg5: memref<128x128xbf16, #tpu.memory_space<vmem>>, %arg6: memref<128x512xbf16, #tpu.memory_space<vmem>>, %arg7: memref<1x512xf32, #tpu.memory_space<vmem>>, %arg8: memref<8x512xf32, #tpu.memory_space<vmem>>) attributes {dimension_semantics = [#tpu.dimension_semantics<parallel>, #tpu.dimension_semantics<parallel>], iteration_bounds = array<i64: 1, 1>, scalar_prefetch = 0 : i64, scratch_operands = 0 : i64, tpu.core_type = #tpu.core_type<tc>, window_params = [{transform_indices = @transform_0, window_bounds = array<i64: 8, 32>}, {pipeline_mode = #tpu.pipeline_mode<synchronous>, transform_indices = @transform_1, window_bounds = array<i64: 32, 128>}, {pipeline_mode = #tpu.pipeline_mode<synchronous>, transform_indices = @transform_2, window_bounds = array<i64: 8, 128>}, {pipeline_mode = #tpu.pipeline_mode<synchronous>, transform_indices = @transform_3, window_bounds = array<i64: 128, 128>}, {transform_indices = @transform_4, window_bounds = array<i64: 128, 512>}, {transform_indices = @transform_5, window_bounds = array<i64: 1, 512>}, {transform_indices = @transform_6, window_bounds = array<i64: 8, 512>}]} {
    %c0 = arith.constant 0 : index
    %c0_0 = arith.constant 0 : index
    %0 = vector.load %arg2[%c0, %c0_0] : memref<8x32xf32, #tpu.memory_space<vmem>>, vector<8x32xf32>
    %c0_1 = arith.constant 0 : index
    %c0_2 = arith.constant 0 : index
    %1 = vector.load %arg4[%c0_1, %c0_2] : memref<8x128xf32, #tpu.memory_space<vmem>>, vector<8x128xf32>
    %2 = vector.extract_strided_slice %1 {offsets = [0, 0], sizes = [1, 128], strides = [1, 1]} : vector<8x128xf32> to vector<1x128xf32>
    %3 = vector.extract_strided_slice %1 {offsets = [1, 0], sizes = [1, 128], strides = [1, 1]} : vector<8x128xf32> to vector<1x128xf32>
    %4 = vector.extract_strided_slice %1 {offsets = [2, 0], sizes = [1, 128], strides = [1, 1]} : vector<8x128xf32> to vector<1x128xf32>
    %5 = vector.extract_strided_slice %1 {offsets = [3, 0], sizes = [1, 128], strides = [1, 1]} : vector<8x128xf32> to vector<1x128xf32>
    %6 = vector.extract_strided_slice %1 {offsets = [4, 0], sizes = [1, 128], strides = [1, 1]} : vector<8x128xf32> to vector<1x128xf32>
    %7 = vector.extract_strided_slice %1 {offsets = [5, 0], sizes = [1, 128], strides = [1, 1]} : vector<8x128xf32> to vector<1x128xf32>
    %8 = arith.truncf %0 : vector<8x32xf32> to vector<8x32xbf16>
    %c0_3 = arith.constant 0 : index
    %c0_4 = arith.constant 0 : index
    %9 = vector.load %arg3[%c0_3, %c0_4] : memref<32x128xbf16, #tpu.memory_space<vmem>>, vector<32x128xbf16>
    %cst = arith.constant dense<0.000000e+00> : vector<8x128xf32>
    %10 = tpu.matmul %8, %9, %cst {dimension_numbers = #tpu.dot_dimension_numbers<[1], [0], [0], [1], [0, 0, 1, 1], [], []>} : vector<8x32xbf16>, vector<32x128xbf16>, vector<8x128xf32> -> vector<8x128xf32>
    %11 = vector.broadcast %2 : vector<1x128xf32> to vector<8x128xf32>
    %12 = arith.addf %10, %11 : vector<8x128xf32>
    %cst_5 = arith.constant 0.000000e+00 : f32
    %13 = vector.broadcast %cst_5 : f32 to vector<8x128xf32>
    %14 = arith.maximumf %12, %13 : vector<8x128xf32>
    %cst_6 = arith.constant dense<0.000000e+00> : vector<8xf32>
    %15 = vector.multi_reduction <add>, %14, %cst_6 [1] : vector<8x128xf32> to vector<8xf32>
    %16 = vector.shape_cast %15 : vector<8xf32> to vector<8x1xf32>
    %17 = arith.mulf %14, %14 : vector<8x128xf32>
    %cst_7 = arith.constant dense<0.000000e+00> : vector<8xf32>
    %18 = vector.multi_reduction <add>, %17, %cst_7 [1] : vector<8x128xf32> to vector<8xf32>
    %19 = vector.shape_cast %18 : vector<8xf32> to vector<8x1xf32>
    %cst_8 = arith.constant 7.812500e-03 : f32
    %20 = vector.broadcast %cst_8 : f32 to vector<8x1xf32>
    %21 = arith.mulf %16, %20 : vector<8x1xf32>
    %cst_9 = arith.constant 7.812500e-03 : f32
    %22 = vector.broadcast %cst_9 : f32 to vector<8x1xf32>
    %23 = arith.mulf %19, %22 : vector<8x1xf32>
    %24 = arith.mulf %21, %21 : vector<8x1xf32>
    %25 = arith.subf %23, %24 : vector<8x1xf32>
    %26 = vector.broadcast %21 : vector<8x1xf32> to vector<8x128xf32>
    %27 = arith.subf %14, %26 : vector<8x128xf32>
    %cst_10 = arith.constant 9.99999974E-6 : f32
    %28 = vector.broadcast %cst_10 : f32 to vector<8x1xf32>
    %29 = arith.addf %25, %28 : vector<8x1xf32>
    %30 = math.rsqrt %29 : vector<8x1xf32>
    %31 = vector.broadcast %30 : vector<8x1xf32> to vector<8x128xf32>
    %32 = arith.mulf %27, %31 : vector<8x128xf32>
    %33 = vector.broadcast %3 : vector<1x128xf32> to vector<8x128xf32>
    %34 = arith.mulf %32, %33 : vector<8x128xf32>
    %35 = vector.broadcast %4 : vector<1x128xf32> to vector<8x128xf32>
    %36 = arith.addf %34, %35 : vector<8x128xf32>
    %37 = arith.truncf %36 : vector<8x128xf32> to vector<8x128xbf16>
    %c0_11 = arith.constant 0 : index
    %c0_12 = arith.constant 0 : index
    %38 = vector.load %arg5[%c0_11, %c0_12] : memref<128x128xbf16, #tpu.memory_space<vmem>>, vector<128x128xbf16>
    %cst_13 = arith.constant dense<0.000000e+00> : vector<8x128xf32>
    %39 = tpu.matmul %37, %38, %cst_13 {dimension_numbers = #tpu.dot_dimension_numbers<[1], [0], [0], [1], [0, 0, 1, 1], [], []>} : vector<8x128xbf16>, vector<128x128xbf16>, vector<8x128xf32> -> vector<8x128xf32>
    %40 = vector.broadcast %5 : vector<1x128xf32> to vector<8x128xf32>
    %41 = arith.addf %39, %40 : vector<8x128xf32>
    %cst_14 = arith.constant 0.000000e+00 : f32
    %42 = vector.broadcast %cst_14 : f32 to vector<8x128xf32>
    %43 = arith.maximumf %41, %42 : vector<8x128xf32>
    %cst_15 = arith.constant dense<0.000000e+00> : vector<8xf32>
    %44 = vector.multi_reduction <add>, %43, %cst_15 [1] : vector<8x128xf32> to vector<8xf32>
    %45 = vector.shape_cast %44 : vector<8xf32> to vector<8x1xf32>
    %46 = arith.mulf %43, %43 : vector<8x128xf32>
    %cst_16 = arith.constant dense<0.000000e+00> : vector<8xf32>
    %47 = vector.multi_reduction <add>, %46, %cst_16 [1] : vector<8x128xf32> to vector<8xf32>
    %48 = vector.shape_cast %47 : vector<8xf32> to vector<8x1xf32>
    %cst_17 = arith.constant 7.812500e-03 : f32
    %49 = vector.broadcast %cst_17 : f32 to vector<8x1xf32>
    %50 = arith.mulf %45, %49 : vector<8x1xf32>
    %cst_18 = arith.constant 7.812500e-03 : f32
    %51 = vector.broadcast %cst_18 : f32 to vector<8x1xf32>
    %52 = arith.mulf %48, %51 : vector<8x1xf32>
    %53 = arith.mulf %50, %50 : vector<8x1xf32>
    %54 = arith.subf %52, %53 : vector<8x1xf32>
    %55 = vector.broadcast %50 : vector<8x1xf32> to vector<8x128xf32>
    %56 = arith.subf %43, %55 : vector<8x128xf32>
    %cst_19 = arith.constant 9.99999974E-6 : f32
    %57 = vector.broadcast %cst_19 : f32 to vector<8x1xf32>
    %58 = arith.addf %54, %57 : vector<8x1xf32>
    %59 = math.rsqrt %58 : vector<8x1xf32>
    %60 = vector.broadcast %59 : vector<8x1xf32> to vector<8x128xf32>
    %61 = arith.mulf %56, %60 : vector<8x128xf32>
    %62 = vector.broadcast %6 : vector<1x128xf32> to vector<8x128xf32>
    %63 = arith.mulf %61, %62 : vector<8x128xf32>
    %64 = vector.broadcast %7 : vector<1x128xf32> to vector<8x128xf32>
    %65 = arith.addf %63, %64 : vector<8x128xf32>
    %66 = arith.addf %36, %65 : vector<8x128xf32>
    %67 = arith.truncf %66 : vector<8x128xf32> to vector<8x128xbf16>
    %c0_20 = arith.constant 0 : index
    %c0_21 = arith.constant 0 : index
    %68 = vector.load %arg6[%c0_20, %c0_21] : memref<128x512xbf16, #tpu.memory_space<vmem>>, vector<128x512xbf16>
    %cst_22 = arith.constant dense<0.000000e+00> : vector<8x512xf32>
    %69 = tpu.matmul %67, %68, %cst_22 {dimension_numbers = #tpu.dot_dimension_numbers<[1], [0], [0], [1], [0, 0, 1, 1], [], []>} : vector<8x128xbf16>, vector<128x512xbf16>, vector<8x512xf32> -> vector<8x512xf32>
    %c0_23 = arith.constant 0 : index
    %c0_24 = arith.constant 0 : index
    %70 = vector.load %arg7[%c0_23, %c0_24] : memref<1x512xf32, #tpu.memory_space<vmem>>, vector<1x512xf32>
    %71 = vector.broadcast %70 : vector<1x512xf32> to vector<8x512xf32>
    %72 = arith.addf %69, %71 : vector<8x512xf32>
    %cst_25 = arith.constant 0.000000e+00 : f32
    %73 = vector.broadcast %cst_25 : f32 to vector<8x512xf32>
    %74 = arith.subf %73, %72 : vector<8x512xf32>
    %75 = math.exp %74 : vector<8x512xf32>
    %cst_26 = arith.constant 1.000000e+00 : f32
    %76 = vector.broadcast %cst_26 : f32 to vector<8x512xf32>
    %77 = arith.addf %76, %75 : vector<8x512xf32>
    %78 = tpu.reciprocal %77 {approx = true} : vector<8x512xf32> -> vector<8x512xf32>
    %cst_27 = arith.constant 1.000000e+00 : f32
    %79 = vector.broadcast %cst_27 : f32 to vector<8x512xf32>
    %80 = arith.minimumf %78, %79 : vector<8x512xf32>
    %c0_28 = arith.constant 0 : index
    %c0_29 = arith.constant 0 : index
    %81 = vector.load %arg8[%c0_28, %c0_29] : memref<8x512xf32, #tpu.memory_space<vmem>>, vector<8x512xf32>
    tpu.vector_store %arg8[%c0_28, %c0_29], %80 {strides = array<i32>} : memref<8x512xf32, #tpu.memory_space<vmem>>, vector<8x512xf32>,
    return
  }
  func.func @transform_0(%arg0: i32, %arg1: i32) -> (i32, i32) {
    %c0_i32 = arith.constant 0 : i32
    %c0_i32_0 = arith.constant 0 : i32
    return %arg0, %c0_i32 : i32, i32
  }
  func.func @transform_1(%arg0: i32, %arg1: i32) -> (i32, i32) {
    %c0_i32 = arith.constant 0 : i32
    %c0_i32_0 = arith.constant 0 : i32
    %c0_i32_1 = arith.constant 0 : i32
    return %c0_i32, %c0_i32_0 : i32, i32
  }
  func.func @transform_2(%arg0: i32, %arg1: i32) -> (i32, i32) {
    %c0_i32 = arith.constant 0 : i32
    %c0_i32_0 = arith.constant 0 : i32
    %c0_i32_1 = arith.constant 0 : i32
    return %c0_i32, %c0_i32_0 : i32, i32
  }
  func.func @transform_3(%arg0: i32, %arg1: i32) -> (i32, i32) {
    %c0_i32 = arith.constant 0 : i32
    %c0_i32_0 = arith.constant 0 : i32
    %c0_i32_1 = arith.constant 0 : i32
    return %c0_i32, %c0_i32_0 : i32, i32
  }
  func.func @transform_4(%arg0: i32, %arg1: i32) -> (i32, i32) {
    %c0_i32 = arith.constant 0 : i32
    %c0_i32_0 = arith.constant 0 : i32
    return %c0_i32, %arg1 : i32, i32
  }
  func.func @transform_5(%arg0: i32, %arg1: i32) -> (i32, i32) {
    %c0_i32 = arith.constant 0 : i32
    %c0_i32_0 = arith.constant 0 : i32
    return %c0_i32, %arg1 : i32, i32
  }
  func.func @transform_6(%arg0: i32, %arg1: i32) -> (i32, i32) {
    %c0_i32 = arith.constant 0 : i32
    return %arg0, %arg1 : i32, i32
  }
}

</mosaic_0001>

<bundles_post_ra>
// kernel: tpu_custom_call.1
= control target key start
LH: loop header
LB: loop body
LE: loop exit
PB: predicated region body
PF: predicated region fallthrough
CT: control target
= control target key end

     0   :  { %11 = vsyncpa [#allocation3], 0  ;;  %s1070_s0 = inlined_call_operand.hbm [shape: f32[8,32], index: 0, kind: input, shape index: {}]   ;;  %s1071_s1 = inlined_call_operand.hbm [shape: bf16[32,128], index: 1, kind: input, shape index: {}]   ;;  %s1072_s2 = inlined_call_operand.hbm [shape: f32[8,128], index: 2, kind: input, shape index: {}]   ;;  %s1073_s3 = inlined_call_operand.hbm [shape: bf16[128,128], index: 3, kind: input, shape index: {}]   ;;  %s1074_s4 = inlined_call_operand.hbm [shape: bf16[128,512], index: 4, kind: input, shape index: {}]   ;;  %s1075_s5 = inlined_call_operand.vmem [shape: f32[1,512], index: 5, kind: input, shape index: {}]   ;;  %s1076_s6 = inlined_call_operand.hbm [shape: f32[8,512], index: 6, kind: output, shape index: {}]  }
   0x1   :  { %12 = vsyncpa [#allocation6], 0 }
   0x2   :  { %13 = vsyncpa [#allocation9], 0 }
   0x3   :  { %14 = vsyncpa [#allocation4], 0  ;;  %s958_s21 = smov [#allocation5]  }
   0x4   :  { %s30_s22 = sshll.u32 %s958_s21, 4  ;;  %s31_s22 = int_to_ptr.vmem [resolvable:$true] %s30_s22 }
   0x5   :  { %s838_s23 = scalar_lea.vmem %s31_s22, 256  ;;  %p843_p1 = scmp.lt.s32.totalorder %s31_s22, %s31_s22 }
   0x6   :  { %p839_p0 = scmp.ne.s32.totalorder %s31_s22, %s838_s23  ;;  %p844_p2 = scmp.lt.s32.totalorder %s838_s23, %s838_s23 }
   0x8   :  { %p845_p3 = por %p844_p2, %p843_p1 }
   0xa   :  { %p846_p4 = pnand %p845_p3, %p839_p0 }
   0xc   :  { %849 = shalt.err (!%p846_p4)
}
   0xd   :  { %s959_s24 = smov 64   ;;  %s960_s25 = smov 4  }
   0xe   :  { %36 = dma.hbm_to_vmem [thread:$0]  %s1071_s1, 256, %s31_s22, [#allocation6], %s959_s24, %s959_s24, %s960_s25  }
   0xf   :  { %s961_s28 = smov [#allocation8]   ;;  %s962_s30 = smov [#allocation2]  }
  0x10   :  { %s52_s29 = sshll.u32 %s961_s28, 4  ;;  %s21_s7 = sshll.u32 %s962_s30, 4  ;;  %s53_s29 = int_to_ptr.vmem [resolvable:$true] %s52_s29  ;;  %s22_s7 = int_to_ptr.vmem [resolvable:$true] %s21_s7 }
  0x11   :  { %s858_s8 = scalar_lea.vmem %s53_s29, 1024  ;;  %p863_p6 = scmp.lt.s32.totalorder %s53_s29, %s53_s29 }
  0x12   :  { %p859_p5 = scmp.ne.s32.totalorder %s53_s29, %s858_s8  ;;  %p864_p7 = scmp.lt.s32.totalorder %s858_s8, %s858_s8 }
  0x14   :  { %p865_p8 = por %p864_p7, %p863_p6 }
  0x16   :  { %p866_p9 = pnand %p865_p8, %p859_p5 }
  0x18   :  { %869 = shalt.err (!%p866_p9)
}
  0x19   :  { %58 = dma.hbm_to_vmem [thread:$0]  %s1073_s3, 1024, %s53_s29, [#allocation9], %s959_s24, %s959_s24, %s960_s25  }
  0x1a   :  { %s878_s11 = scalar_lea.vmem %s22_s7, 128  ;;  %p883_p11 = scmp.lt.s32.totalorder %s22_s7, %s22_s7 }
  0x1b   :  { %p879_p10 = scmp.ne.s32.totalorder %s22_s7, %s878_s11  ;;  %p884_p12 = scmp.lt.s32.totalorder %s878_s11, %s878_s11 }
  0x1d   :  { %p885_p13 = por %p884_p12, %p883_p11 }
  0x1f   :  { %p886_p0 = pnand %p885_p13, %p879_p10 }
  0x21   :  { %889 = shalt.err (!%p886_p0)
}
  0x22   :  { %24 = dma.hbm_to_vmem [thread:$0]  %s1070_s0, 128, %s22_s7, [#allocation3]  }
  0x23   :  { %s963_s13 = smov [#allocation7]   ;;  %s964_s15 = smov [#allocation10]  }
  0x24   :  { %s43_s14 = sshll.u32 %s963_s13, 4  ;;  %s64_s16 = sshll.u32 %s964_s15, 4  ;;  %s44_s14 = int_to_ptr.vmem [resolvable:$true] %s43_s14  ;;  %s65_s16 = int_to_ptr.vmem [resolvable:$true] %s64_s16 }
  0x25   :  { %s898_s17 = scalar_lea.vmem %s44_s14, 128  ;;  %p903_p2 = scmp.lt.s32.totalorder %s44_s14, %s44_s14 }
  0x26   :  { %p899_p1 = scmp.ne.s32.totalorder %s44_s14, %s898_s17  ;;  %p904_p3 = scmp.lt.s32.totalorder %s898_s17, %s898_s17 }
  0x28   :  { %p905_p4 = por %p904_p3, %p903_p2 }
  0x2a   :  { %p906_p5 = pnand %p905_p4, %p899_p1 }
  0x2c   :  { %909 = shalt.err (!%p906_p5)
}
  0x2d   :  { %46 = dma.hbm_to_vmem [thread:$0]  %s1072_s2, 128, %s44_s14, [#allocation6]  }
  0x2e   :  { %s918_s19 = scalar_lea.vmem %s65_s16, 4096  ;;  %p923_p7 = scmp.lt.s32.totalorder %s65_s16, %s65_s16 }
  0x2f   :  { %p919_p6 = scmp.ne.s32.totalorder %s65_s16, %s918_s19  ;;  %p924_p8 = scmp.lt.s32.totalorder %s918_s19, %s918_s19 }
  0x31   :  { %p925_p9 = por %p924_p8, %p923_p7 }
  0x33   :  { %p926_p10 = pnand %p925_p9, %p919_p6 }
  0x35   :  { %929 = shalt.err (!%p926_p10)
}
  0x36   :  { %s965_s0 = smov 256   ;;  %s966_s20 = smov 16  }
  0x37   :  { %70 = dma.hbm_to_vmem [thread:$0]  %s1074_s4, 4096, %s65_s16, [#allocation9], %s965_s0, %s965_s0, %s966_s20  }
  0x38   :  { %950 = dma.done.wait [#allocation3], 128  }
  0x39   :  { %951 = vsyncadd [#allocation3], 4294967168 }
  0x3a   :  { %952 = dma.done.wait [#allocation6], 384  }
  0x3b   :  { %953 = vsyncadd [#allocation6], 4294966912 }
  0x3c   :  { %954 = dma.done.wait [#allocation9], 5120  }
  0x3d   :  { %955 = vsyncadd [#allocation9], 4294962176  ;;  %v967_v0 = vmov 0.0   ;;  %vm968_vm0 = vmmov 0   ;;  %v752_v1 = vld [vmem:[#allocation5 + $0x8] sm:$0xff]   ;;  %v753_v2 = vld [vmem:[#allocation5] sm:$0xff]   ;;  %v96_v5 = vlaneseq }
  0x3e   :  { %711 = vmatprep.subr.bf16.mxu0 %v967_v0  ;;  %715 = vmatprep.mubr.msk.bf16.mxu0 %vm968_vm0, %v967_v0  ;;  %v89_v3 = vld [vmem:[#allocation2] sm:$0xff]  ;;  %vm112_vm1 = vcmask 261120   ;;  %v1024_v8 = vld [vmem:[#allocation7] sm:$0xff]  ;;  %v755_v18 = vld [vmem:[#allocation8 + $0x30] sm:$0xff]  }
  0x3f   :  { %719 = vmatprep.subr.bf16.mxu1 %v967_v0  ;;  %735 = vmatprep.mubr.msk.bf16.mxu1 %vm968_vm0, %v967_v0  ;;  %v91_v4 = vpack.c.bf16 %v89_v3, %v89_v3  ;;  %v1021_v6 = vshrl.u32 %v96_v5, 7  ;;  %v754_v17 = vld [vmem:[#allocation8 + $0x38] sm:$0xff]   ;;  %v756_v19 = vld [vmem:[#allocation8 + $0x28] sm:$0xff]   ;;  %v757_v20 = vld [vmem:[#allocation8 + $0x20] sm:$0xff]  }
  0x40   :  { %712 = vmatpush3.bf16.msra.mxu0 %v752_v1  ;;  %720 = vmatpush3.bf16.msra.mxu1 %v754_v17  ;;  %v758_v21 = vld [vmem:[#allocation8 + $0x18] sm:$0xff]   ;;  %v759_v22 = vld [vmem:[#allocation8 + $0x10] sm:$0xff]   ;;  %v760_v23 = vld [vmem:[#allocation8 + $0x8] sm:$0xff]  }
  0x41   :  { %713 = vmatprep.subr.bf16.mxu0 %v967_v0  ;;  %v98_v7 = vsub.s32 0, %v1021_v6  ;;  %721 = vmatprep.subr.bf16.mxu1 %v967_v0  ;;  %v761_v24 = vld [vmem:[#allocation8] sm:$0xff]   ;;  %v172_v32 = vsub.s32 1, %v1021_v6  ;;  %v177_v33 = vsub.s32 2, %v1021_v6  ;;  %v199_v42 = vsub.s32 3, %v1021_v6 }
  0x42   :  { %v764_v51 = vld [vmem:[#allocation10 + $0xe4] ss:$16 sps:$4 sm:$0xff]   ;;  %v767_v52 = vld [vmem:[#allocation10 + $0xec] ss:$16 sps:$4 sm:$0xff]   ;;  %v762_v53 = vld [vmem:[#allocation10 + $0xe0] ss:$16 sps:$4 sm:$0xff]  }
  0x43   :  { %v99_v9 = vrot.slane %v1024_v8, %v98_v7  ;;  %v173_v35 = vrot.slane %v1024_v8, %v172_v32  ;;  %v178_v38 = vrot.slane %v1024_v8, %v177_v33  ;;  %v200_v43 = vrot.slane %v1024_v8, %v199_v42  ;;  %v765_v54 = vld [vmem:[#allocation10 + $0xe8] ss:$16 sps:$4 sm:$0xff]   ;;  %v770_v55 = vld [vmem:[#allocation10 + $0xc4] ss:$16 sps:$4 sm:$0xff]   ;;  %v773_v56 = vld [vmem:[#allocation10 + $0xcc] ss:$16 sps:$4 sm:$0xff]  }
  0x44   :  { %714 = vmatpush3.bf16.msra.mxu0 %v753_v2  ;;  %722 = vmatpush3.bf16.msra.mxu1 %v755_v18  ;;  %v768_v57 = vld [vmem:[#allocation10 + $0xc0] ss:$16 sps:$4 sm:$0xff]   ;;  %v771_v58 = vld [vmem:[#allocation10 + $0xc8] ss:$16 sps:$4 sm:$0xff]   ;;  %v776_v59 = vld [vmem:[#allocation10 + $0xa4] ss:$16 sps:$4 sm:$0xff]  }
  0x45   :  { %723 = vmatprep.subr.bf16.mxu1 %v967_v0  ;;  %529 = vmatprep.subr.bf16.mxu0 %v764_v51  ;;  %v779_v60 = vld [vmem:[#allocation10 + $0xac] ss:$16 sps:$4 sm:$0xff]   ;;  %v774_v61 = vld [vmem:[#allocation10 + $0xa0] ss:$16 sps:$4 sm:$0xff]   ;;  %v777_v62 = vld [vmem:[#allocation10 + $0xa8] ss:$16 sps:$4 sm:$0xff]  }
  0x46   :  { %v782_v63 = vld [vmem:[#allocation10 + $0x84] ss:$16 sps:$4 sm:$0xff]   ;;  %v783_v1 = vld [vmem:[#allocation10 + $0x88] ss:$16 sps:$4 sm:$0xff]   ;;  %v785_v2 = vld [vmem:[#allocation10 + $0x8c] ss:$16 sps:$4 sm:$0xff]  }
  0x47   :  { %716 = vmatmul.mubr.msk.bf16.vlgmr.msra.gmra.mxu0 %vm112_vm1, %v91_v4  ;;  %v788_v3 = vld [vmem:[#allocation10 + $0x64] ss:$16 sps:$4 sm:$0xff]   ;;  %v791_v4 = vld [vmem:[#allocation10 + $0x6c] ss:$16 sps:$4 sm:$0xff]   ;;  %v786_v5 = vld [vmem:[#allocation10 + $0x60] ss:$16 sps:$4 sm:$0xff]  }
  0x48   :  { %724 = vmatpush3.bf16.msra.mxu1 %v756_v19  ;;  %530 = vmatpush1.bf16.msra.mxu0 %v762_v53  ;;  %v798_v17 = vld [vmem:[#allocation10 + $0x20] ss:$16 sps:$4 sm:$0xff]   ;;  %v801_v18 = vld [vmem:[#allocation10 + $0x28] ss:$16 sps:$4 sm:$0xff]   ;;  %v806_v19 = vld [vmem:[#allocation10 + $0x4] ss:$16 sps:$4 sm:$0xff]  }
  0x49   :  { %725 = vmatprep.subr.bf16.mxu1 %v967_v0  ;;  %531 = vmatprep.subr.bf16.mxu0 %v770_v55 }
  0x4c   :  { %726 = vmatpush3.bf16.msra.mxu1 %v757_v20  ;;  %532 = vmatpush1.bf16.msra.mxu0 %v768_v57  ;;  %v809_v20 = vld [vmem:[#allocation10 + $0xc] ss:$16 sps:$4 sm:$0xff]  }
  0x4d   :  { %727 = vmatprep.subr.bf16.mxu1 %v967_v0  ;;  %533 = vmatprep.subr.bf16.mxu0 %v776_v59 }
  0x50   :  { %728 = vmatpush3.bf16.msra.mxu1 %v758_v21  ;;  %534 = vmatpush1.bf16.msra.mxu0 %v774_v61  ;;  %v804_v21 = vld [vmem:[#allocation10] ss:$16 sps:$4 sm:$0xff]  }
  0x51   :  { %729 = vmatprep.subr.bf16.mxu1 %v967_v0  ;;  %535 = vmatprep.subr.bf16.mxu0 %v782_v63 }
  0x54   :  { %730 = vmatpush3.bf16.msra.mxu1 %v759_v22  ;;  %v807_v22 = vld [vmem:[#allocation10 + $0x8] ss:$16 sps:$4 sm:$0xff]  }
  0x55   :  { %731 = vmatprep.subr.bf16.mxu1 %v967_v0 }
  0x58   :  { %732 = vmatpush3.bf16.msra.mxu1 %v760_v23 }
  0x59   :  { %733 = vmatprep.subr.bf16.mxu1 %v967_v0  ;;  %v780_v0 = vld [vmem:[#allocation10 + $0x80] ss:$16 sps:$4 sm:$0xff]  }
  0x5a   :  { %536 = vmatpush1.bf16.msra.mxu0 %v780_v0 }
  0x5b   :  { %537 = vmatprep.subr.bf16.mxu0 %v788_v3 }
  0x5c   :  { %734 = vmatpush3.bf16.msra.mxu1 %v761_v24 }
  0x5d   :  { %570 = vmatprep.subr.bf16.mxu1 %v767_v52 }
  0x5e   :  { %538 = vmatpush1.bf16.msra.mxu0 %v786_v5 }
 0x107   :  { %v150_v10 = vpop.f32.mrf.mxu0 }
 0x108   :  { %v151_v11 = vadd.f32 %v150_v10, %v99_v9  ;;  %v789_v9 = vld [vmem:[#allocation10 + $0x68] ss:$16 sps:$4 sm:$0xff]   ;;  %v794_v10 = vld [vmem:[#allocation10 + $0x44] ss:$16 sps:$4 sm:$0xff]  }
 0x109   :  { %v717_v12 = vpop.f32.mrf.mxu0  ;;  %539 = vmatprep.subr.bf16.mxu0 %v794_v10 }
 0x10a   :  { %v156_v13 = vmax.f32 %v151_v11, 0.0  ;;  %v797_v11 = vld [vmem:[#allocation10 + $0x4c] ss:$16 sps:$4 sm:$0xff]   ;;  %v969_v12 = vmov 0  }
 0x10b   :  { %v153_v14 = vpop.f32.mrf.mxu0  ;;  %561 = vmatprep.mubr.bf16.mxu0 %v969_v12 }
 0x10c   :  { %157 = vadd.xlane.f32.xlu0 %v156_v13  ;;  %v159_v16 = vmul.f32 %v156_v13, %v156_v13  ;;  %v795_v14 = vld [vmem:[#allocation10 + $0x48] ss:$16 sps:$4 sm:$0xff]  }
 0x10d   :  { %v718_v15 = vpop.f32.mrf.mxu0 }
 0x10e   :  { %v800_v15 = vld [vmem:[#allocation10 + $0x24] ss:$16 sps:$4 sm:$0xff]  }
 0x110   :  { %160 = vadd.xlane.f32.xlu0 %v159_v16  ;;  %v803_v16 = vld [vmem:[#allocation10 + $0x2c] ss:$16 sps:$4 sm:$0xff]  }
 0x195   :  { %v158_v25 = vpop.xlane.xlu0 %157 }
 0x196   :  { %v162_v26 = vmul.f32 0.0078125, %v158_v25 }
 0x198   :  { %v164_v28 = vmul.f32 %v162_v26, %v162_v26  ;;  %v166_v34 = vsub.f32 %v156_v13, %v162_v26  ;;  %v792_v13 = vld [vmem:[#allocation10 + $0x40] ss:$16 sps:$4 sm:$0xff]  }
 0x199   :  { %v161_v27 = vpop.xlane.xlu0 %160  ;;  %540 = vmatpush1.bf16.msra.mxu0 %v792_v13 }
 0x19a   :  { %v163_v29 = vmul.f32 0.0078125, %v161_v27  ;;  %541 = vmatprep.subr.bf16.mxu0 %v800_v15 }
 0x19c   :  { %v165_v30 = vsub.f32 %v163_v29, %v164_v28 }
 0x19d   :  { %542 = vmatpush1.bf16.msra.mxu0 %v798_v17 }
 0x19e   :  { %v167_v31 = vadd.f32 1e-05, %v165_v30  ;;  %543 = vmatprep.subr.bf16.mxu0 %v806_v19  ;;  %v305_v30 = vsub.s32 4, %v1021_v6 }
 0x1a0   :  { %810 = vrsqrt.f32 %v167_v31  ;;  %v310_v31 = vsub.s32 5, %v1021_v6 }
 0x1a1   :  { %544 = vmatpush1.bf16.msra.mxu0 %v804_v21 }
 0x1ad   :  { %v811_v36 = vpop.eup %810 }
 0x1ae   :  { %v169_v37 = vmul.f32 %v811_v36, %v166_v34 }
 0x1b0   :  { %v174_v39 = vmul.f32 %v173_v35, %v169_v37  ;;  %v306_v35 = vrot.slane %v1024_v8, %v305_v30 }
 0x1b2   :  { %v1037_v40 = vadd.f32 %v178_v38, %v174_v39  ;;  %v311_v38 = vrot.slane %v1024_v8, %v310_v31 }
 0x1b4   :  { %v180_v41 = vpack.c.bf16 %v1037_v40, %v1037_v40 }
 0x1b6   :  { %736 = vmatmul.mubr.bf16.vlgmr.msra.gmra.mxu1 %v180_v41 }
 0x1b7   :  { %571 = vmatpush1.bf16.msra.mxu1 %v765_v54  ;;  %602 = vmatprep.mubr.bf16.mxu1 %v969_v12 }
 0x1b8   :  { %572 = vmatprep.subr.bf16.mxu1 %v773_v56 }
 0x1bb   :  { %573 = vmatpush1.bf16.msra.mxu1 %v771_v58 }
 0x1bc   :  { %574 = vmatprep.subr.bf16.mxu1 %v779_v60 }
 0x1bf   :  { %575 = vmatpush1.bf16.msra.mxu1 %v777_v62 }
 0x1c0   :  { %576 = vmatprep.subr.bf16.mxu1 %v785_v2 }
 0x1c3   :  { %577 = vmatpush1.bf16.msra.mxu1 %v783_v1 }
 0x1c4   :  { %578 = vmatprep.subr.bf16.mxu1 %v791_v4 }
 0x1c7   :  { %579 = vmatpush1.bf16.msra.mxu1 %v789_v9 }
 0x1c8   :  { %580 = vmatprep.subr.bf16.mxu1 %v797_v11 }
 0x1cb   :  { %581 = vmatpush1.bf16.msra.mxu1 %v795_v14 }
 0x1cc   :  { %582 = vmatprep.subr.bf16.mxu1 %v803_v16 }
 0x1cf   :  { %583 = vmatpush1.bf16.msra.mxu1 %v801_v18 }
 0x1d0   :  { %584 = vmatprep.subr.bf16.mxu1 %v809_v20 }
 0x1d3   :  { %585 = vmatpush1.bf16.msra.mxu1 %v807_v22 }
 0x276   :  { %v283_v44 = vpop.f32.mrf.mxu1 }
 0x277   :  { %v284_v45 = vadd.f32 %v283_v44, %v200_v43 }
 0x278   :  { %v737_v46 = vpop.f32.mrf.mxu1 }
 0x279   :  { %v1045_v47 = vmax.f32 %v284_v45, 0.0  ;;  %v347_v45 = vld [vmem:[%s1075_s5] sm:$0xf]  ;;  %s970_s5 = smov [#allocation11]  }
 0x27a   :  { %v286_v48 = vpop.f32.mrf.mxu1  ;;  %v352_v46 = vrot.slane %v347_v45, %v98_v7  ;;  %v356_v8 = vrot.slane %v347_v45, %v172_v32  ;;  %s645_s23 = sshll.u32 %s970_s5, 4  ;;  %s646_s23 = int_to_ptr.vmem [resolvable:$true] %s645_s23 }
 0x27b   :  { %290 = vadd.xlane.f32.xlu1 %v1045_v47  ;;  %v292_v50 = vmul.f32 %v1045_v47, %v1045_v47  ;;  %v364_v48 = vrot.slane %v347_v45, %v199_v42  ;;  %s930_s24 = scalar_lea.vmem %s646_s23, 512  ;;  %p935_p12 = scmp.lt.s32.totalorder %s646_s23, %s646_s23 }
 0x27c   :  { %v738_v49 = vpop.f32.mrf.mxu1  ;;  %p931_p11 = scmp.ne.s32.totalorder %s646_s23, %s930_s24  ;;  %p936_p13 = scmp.lt.s32.totalorder %s930_s24, %s930_s24 }
 0x27e   :  { %p937_p0 = por %p936_p13, %p935_p12 }
 0x27f   :  { %293 = vadd.xlane.f32.xlu1 %v292_v50 }
 0x280   :  { %p938_p1 = pnand %p937_p0, %p931_p11 }
 0x304   :  { %v291_v23 = vpop.xlane.xlu1 %290 }
 0x305   :  { %v295_v24 = vmul.f32 0.0078125, %v291_v23 }
 0x307   :  { %v297_v26 = vmul.f32 %v295_v24, %v295_v24  ;;  %v299_v34 = vsub.f32 %v1045_v47, %v295_v24  ;;  %v360_v47 = vrot.slane %v347_v45, %v177_v33 }
 0x308   :  { %v294_v25 = vpop.xlane.xlu1 %293 }
 0x309   :  { %v296_v27 = vmul.f32 0.0078125, %v294_v25 }
 0x30b   :  { %v298_v28 = vsub.f32 %v296_v27, %v297_v26 }
 0x30d   :  { %v300_v29 = vadd.f32 1e-05, %v298_v28 }
 0x30f   :  { %812 = vrsqrt.f32 %v300_v29 }
 0x31c   :  { %v813_v36 = vpop.eup %812 }
 0x31d   :  { %v302_v37 = vmul.f32 %v813_v36, %v299_v34 }
 0x31f   :  { %v307_v39 = vmul.f32 %v306_v35, %v302_v37 }
 0x321   :  { %v312_v41 = vadd.f32 %v311_v38, %v307_v39 }
 0x323   :  { %v313_v43 = vadd.f32 %v312_v41, %v1037_v40 }
 0x325   :  { %v314_v44 = vpack.c.bf16 %v313_v43, %v313_v43 }
 0x327   :  { %562 = vmatmul.mubr.bf16.vlgmr.msra.gmra.mxu0 %v314_v44  ;;  %603 = vmatmul.mubr.bf16.vlgmr.msra.gmra.mxu1 %v314_v44 }
 0x3e7   :  { %v563_v40 = vpop.f32.mrf.mxu0  ;;  %v604_v49 = vpop.f32.mrf.mxu1 }
 0x3e8   :  { %v564_v50 = vadd.f32 %v563_v40, %v352_v46  ;;  %v605_v51 = vadd.f32 %v604_v49, %v360_v47 }
 0x3e9   :  { %v565_v52 = vpop.f32.mrf.mxu0  ;;  %v606_v53 = vpop.f32.mrf.mxu1 }
 0x3ea   :  { %v611_v54 = vsub.f32 0.0, %v564_v50  ;;  %v613_v55 = vsub.f32 0.0, %v605_v51  ;;  %v566_v56 = vadd.f32 %v565_v52, %v356_v8  ;;  %v607_v57 = vadd.f32 %v606_v53, %v364_v48 }
 0x3eb   :  { %v567_v7 = vpop.f32.mrf.mxu0  ;;  %v608_v58 = vpop.f32.mrf.mxu1 }
 0x3ec   :  { %v615_v59 = vmul.f32 1.442695, %v611_v54  ;;  %v619_v33 = vmul.f32 1.442695, %v613_v55  ;;  %v612_v60 = vsub.f32 0.0, %v566_v56  ;;  %v614_v61 = vsub.f32 0.0, %v607_v57 }
 0x3ed   :  { %v568_v32 = vpop.f32.mrf.mxu0  ;;  %v609_v62 = vpop.f32.mrf.mxu1 }
 0x3ee   :  { %814 = vpow2.f32 %v615_v59  ;;  %v617_v6 = vmul.f32 1.442695, %v612_v60  ;;  %v621_v42 = vmul.f32 1.442695, %v614_v61 }
 0x3ef   :  { %816 = vpow2.f32 %v619_v33 }
 0x3f0   :  { %818 = vpow2.f32 %v617_v6 }
 0x3f1   :  { %820 = vpow2.f32 %v621_v42 }
 0x3fb   :  { %v815_v63 = vpop.eup %814 }
 0x3fc   :  { %v817_v0 = vpop.eup %816  ;;  %v623_v1 = vadd.f32 1.0, %v815_v63 }
 0x3fd   :  { %v819_v2 = vpop.eup %818  ;;  %v625_v3 = vadd.f32 1.0, %v817_v0 }
 0x3fe   :  { %v821_v4 = vpop.eup %820  ;;  %822 = vrcp.f32 %v623_v1  ;;  %v624_v5 = vadd.f32 1.0, %v819_v2 }
 0x3ff   :  { %824 = vrcp.f32 %v625_v3  ;;  %v626_v9 = vadd.f32 1.0, %v821_v4 }
 0x400   :  { %826 = vrcp.f32 %v624_v5 }
 0x401   :  { %828 = vrcp.f32 %v626_v9 }
 0x40b   :  { %v823_v10 = vpop.eup %822 }
 0x40c   :  { %v825_v11 = vpop.eup %824  ;;  %v631_v12 = vmin.f32 %v823_v10, 1.0 }
 0x40d   :  { %v827_v13 = vpop.eup %826  ;;  %v633_v14 = vmin.f32 %v825_v11, 1.0 }
 0x40e   :  { %v829_v15 = vpop.eup %828  ;;  %635 = vst [vmem:[#allocation11] sm:$0xff] %v631_v12  ;;  %v632_v16 = vmin.f32 %v827_v13, 1.0 }
 0x40f   :  { %637 = vst [vmem:[#allocation11 + $0x10] sm:$0xff] %v633_v14  ;;  %v634_v17 = vmin.f32 %v829_v15, 1.0 }
 0x410   :  { %636 = vst [vmem:[#allocation11 + $0x8] sm:$0xff] %v632_v16 }
 0x411   :  { %638 = vst [vmem:[#allocation11 + $0x18] sm:$0xff] %v634_v17 }
 0x412   :  { %941 = shalt.err (!%p938_p1)
}
 0x413   :  { %648 = dma.vmem_to_hbm [thread:$0]  %s646_s23, 512, %s1076_s6, [#allocation4]  }
 0x414   :  { %956 = dma.done.wait [#allocation4], 512  }
 0x415   :  { %957 = vsyncadd [#allocation4], 4294966784 }
 0x416   :  { %652 = vsyncpa [#allocation3], 1 }
 0x417   :  { %653 = vsyncpa [#allocation6], 1 }
 0x418   :  { %654 = vsyncpa [#allocation9], 1 }
 0x419   :  { %655 = vsyncpa [#allocation4], 1 }

</bundles_post_ra>
